<compile_context>
chip_gen: v5e
topology: v5e:2x2
jax: 0.10.0
libtpu: 0.0.40
codegen_flags: <defaults>
</compile_context>

<pallas_src>
import functools

import jax
import jax.numpy as jnp
from jax.experimental import pallas as pl
from jax.experimental.pallas import tpu as pltpu

_FUSED_VMEM_BUDGET = 24 << 20      # conservative; fits the 32 MiB scoped limit we request
_RESIDENT_VMEM_BUDGET = 24 << 20   # resident-base budget for the tiled plan


def _round_up(x, m):
    return ((x + m - 1) // m) * m


# --------------------------------------------------------------------------- kernels
def _fused_kernel(a_ref, x_ref, w_ref, b_ref, o_ref, base_ref, *, n_prop):
    """Whole forward in one call: base = X@W; n_prop hops of base = A@base; + bias.

    A, X, W, bias and the f32 base all stay VMEM-resident, so adjacency is read from
    HBM once for all hops and the intermediate base never round-trips through HBM.
    """
    base_ref[...] = jnp.dot(x_ref[...], w_ref[...],
                            preferred_element_type=jnp.float32)
    # TODO(synk): dropout is identity (inference / training=False); PyTorch's RNG
    # stream cannot be reproduced. Training-mode dropout would use pltpu.prng_seed +
    # pltpu.stateful_bernoulli on the fresh base.
    for _ in range(n_prop):   # iterations is a compile-time constant -> static unroll
        base_ref[...] = jnp.dot(a_ref[...], base_ref[...].astype(a_ref.dtype),
                                preferred_element_type=jnp.float32)
    o_ref[...] = base_ref[...] + b_ref[...]


def _xw_kernel(*refs, add_bias):
    """base = features @ weight for one row tile (bias fused only when final)."""
    if add_bias:
        x_ref, w_ref, b_ref, o_ref = refs
    else:
        x_ref, w_ref, o_ref = refs
        b_ref = None
    acc = jnp.dot(x_ref[...], w_ref[...], preferred_element_type=jnp.float32)
    # TODO(synk): dropout identity (see _fused_kernel).
    if add_bias:
        acc = acc + b_ref[...]
    o_ref[...] = acc.astype(o_ref.dtype)


def _prop_kernel(*refs, tk, add_bias, resident):
    """out[i] = sum_k A[i,k] @ base[k]  (f32 VMEM accumulator; bias fused when final).

    resident=True : base is a single VMEM-resident (N_pad, Cout_pad) block (constant
                    index_map -> fetched once) sliced in-kernel, so it is NOT
                    re-streamed from HBM for every row tile.
    resident=False: base streamed per K block (fallback for bases larger than VMEM).
    """
    if add_bias:
        a_ref, base_ref, b_ref, o_ref, acc_ref = refs
    else:
        a_ref, base_ref, o_ref, acc_ref = refs
        b_ref = None
    k = pl.program_id(1)

    @pl.when(k == 0)
    def _():
        acc_ref[...] = jnp.zeros_like(acc_ref)

    if resident:
        start = pl.multiple_of(k * tk, tk)
        base_tile = base_ref[pl.ds(start, tk), :]
    else:
        base_tile = base_ref[...]
    acc_ref[...] += jnp.dot(a_ref[...], base_tile.astype(a_ref.dtype),
                            preferred_element_type=jnp.float32)

    @pl.when(k == pl.num_programs(1) - 1)
    def _():
        acc = acc_ref[...]
        if add_bias:
            acc = acc + b_ref[...]
        o_ref[...] = acc.astype(o_ref.dtype)


# --------------------------------------------------------------------------- wrapper
def dense_ngcn_forward(adjacency, features, weight, bias, *, iterations,
                       compute_dtype=jnp.bfloat16, tile=512, mode="auto",
                       resident_base=None):
    """DenseNGCNLayer forward pass (dropout = identity / inference mode).

    mode: "auto" | "fused" | "tiled".  "auto" uses the fused single-call plan whenever
    the whole problem fits VMEM, otherwise the tiled per-hop plan.
    resident_base: None = auto, or force True/False for the tiled plan (testing).
    """
    n, c_in = features.shape
    c_out = weight.shape[1]
    assert adjacency.shape == (n, n)
    assert weight.shape == (c_in, c_out)
    assert bias.shape == (1, c_out)
    assert tile % 128 == 0 and tile >= 128
    n_prop = max(int(iterations) - 1, 0)

    cin_pad = _round_up(c_in, 128)
    cout_pad = _round_up(c_out, 128)
    itemsize = jnp.dtype(compute_dtype).itemsize

    # ------------------------------------------------------------- plan selection
    n_pad_min = _round_up(n, 128)          # layout minimum (A lane dim / MXU K dim)
    fused_bytes = (2 * n_pad_min * n_pad_min * itemsize      # A (double-buffered)
                   + 2 * n_pad_min * cin_pad * itemsize      # X
                   + 2 * cin_pad * cout_pad * itemsize       # W
                   + 2 * cout_pad * 4                        # bias
                   + 2 * n_pad_min * cout_pad * 4            # output
                   + n_pad_min * cout_pad * 4)               # f32 base scratch
    fused_ok = n_prop > 0 and fused_bytes <= _FUSED_VMEM_BUDGET
    if mode == "fused":
        assert fused_ok, "fused plan does not fit in VMEM for this problem size"
        use_fused = True
    elif mode == "tiled":
        use_fused = False
    else:
        use_fused = fused_ok

    # ------------------------------------------------------------- fused plan
    if use_fused:
        n_pad = n_pad_min
        a = jnp.zeros((n_pad, n_pad), compute_dtype).at[:n, :n].set(
            adjacency.astype(compute_dtype))
        x = jnp.zeros((n_pad, cin_pad), compute_dtype).at[:n, :c_in].set(
            features.astype(compute_dtype))
        w = jnp.zeros((cin_pad, cout_pad), compute_dtype).at[:c_in, :c_out].set(
            weight.astype(compute_dtype))
        b = jnp.zeros((1, cout_pad), jnp.float32).at[:, :c_out].set(
            bias.astype(jnp.float32))
        out = pl.pallas_call(
            functools.partial(_fused_kernel, n_prop=n_prop),
            out_shape=jax.ShapeDtypeStruct((n_pad, cout_pad), jnp.float32),
            grid_spec=pltpu.PrefetchScalarGridSpec(
                num_scalar_prefetch=0,
                grid=(1,),
                in_specs=[
                    pl.BlockSpec((n_pad, n_pad), lambda i: (0, 0)),        # adjacency
                    pl.BlockSpec((n_pad, cin_pad), lambda i: (0, 0)),      # features
                    pl.BlockSpec((cin_pad, cout_pad), lambda i: (0, 0)),   # weight
                    pl.BlockSpec((1, cout_pad), lambda i: (0, 0)),         # bias
                ],
                out_specs=pl.BlockSpec((n_pad, cout_pad), lambda i: (0, 0)),
                scratch_shapes=[pltpu.VMEM((n_pad, cout_pad), jnp.float32)],
            ),
            compiler_params=pltpu.CompilerParams(
                dimension_semantics=("arbitrary",),
                vmem_limit_bytes=32 << 20),
        )(a, x, w, b)
        return out[:n, :c_out]

    # ------------------------------------------------------------- tiled plan
    # Tile choice: clamp to the (128-padded) problem, keep >=2 row tiles so the
    # "parallel" axis feeds both v7x TensorCores (no-op on single-TC v5e/v6e).
    tm = min(tile, n_pad_min)
    if n_pad_min // tm < 2 and tm > 128:
        tm = max(128, (n_pad_min // 2) // 128 * 128)
    tk = tm                                   # tm == tk -> n_pad divisible by both
    n_pad = _round_up(n, tm)

    x = jnp.zeros((n_pad, cin_pad), compute_dtype).at[:n, :c_in].set(
        features.astype(compute_dtype))
    w = jnp.zeros((cin_pad, cout_pad), compute_dtype).at[:c_in, :c_out].set(
        weight.astype(compute_dtype))
    b = jnp.zeros((1, cout_pad), jnp.float32).at[:, :c_out].set(
        bias.astype(jnp.float32))

    if resident_base is None:
        resident_bytes = (2 * n_pad * cout_pad * 4    # resident f32 base (worst-case x2)
                          + 2 * tm * tk * itemsize    # adjacency tiles
                          + 2 * tm * cout_pad * 4     # output tiles
                          + tm * cout_pad * 4         # f32 accumulator
                          + 2 * cout_pad * 4)         # bias
        resident = n_prop > 0 and resident_bytes <= _RESIDENT_VMEM_BUDGET
    else:
        resident = bool(resident_base) and n_prop > 0

    # f32 intermediates when VMEM-resident (negligible extra HBM, no bf16 compounding
    # across hops); bf16 when streamed (halves the restream traffic).
    mid_dtype = jnp.float32 if resident else compute_dtype

    def xw_call(out_dtype, add_bias):
        in_specs = [pl.BlockSpec((tm, cin_pad), lambda i: (i, 0)),
                    pl.BlockSpec((cin_pad, cout_pad), lambda i: (0, 0))]
        args = [x, w]
        if add_bias:
            in_specs.append(pl.BlockSpec((1, cout_pad), lambda i: (0, 0)))
            args.append(b)
        return pl.pallas_call(
            functools.partial(_xw_kernel, add_bias=add_bias),
            out_shape=jax.ShapeDtypeStruct((n_pad, cout_pad), out_dtype),
            grid_spec=pltpu.PrefetchScalarGridSpec(
                num_scalar_prefetch=0,
                grid=(n_pad // tm,),
                in_specs=in_specs,
                out_specs=pl.BlockSpec((tm, cout_pad), lambda i: (i, 0)),
            ),
            compiler_params=pltpu.CompilerParams(
                dimension_semantics=("parallel",)),
        )(*args)

    if n_prop == 0:
        out = xw_call(jnp.float32, add_bias=True)
        return out[:n, :c_out]

    a = jnp.zeros((n_pad, n_pad), compute_dtype).at[:n, :n].set(
        adjacency.astype(compute_dtype))

    def prop_call(base, out_dtype, add_bias):
        if resident:
            base_spec = pl.BlockSpec((n_pad, cout_pad), lambda i, k: (0, 0))
        else:
            base_spec = pl.BlockSpec((tk, cout_pad), lambda i, k: (k, 0))
        in_specs = [pl.BlockSpec((tm, tk), lambda i, k: (i, k)), base_spec]
        args = [a, base]
        if add_bias:
            in_specs.append(pl.BlockSpec((1, cout_pad), lambda i, k: (0, 0)))
            args.append(b)
        return pl.pallas_call(
            functools.partial(_prop_kernel, tk=tk, add_bias=add_bias,
                              resident=resident),
            out_shape=jax.ShapeDtypeStruct((n_pad, cout_pad), out_dtype),
            grid_spec=pltpu.PrefetchScalarGridSpec(
                num_scalar_prefetch=0,
                grid=(n_pad // tm, n_pad // tk),
                in_specs=in_specs,
                out_specs=pl.BlockSpec((tm, cout_pad), lambda i, k: (i, 0)),
                scratch_shapes=[pltpu.VMEM((tm, cout_pad), jnp.float32)],
            ),
            compiler_params=pltpu.CompilerParams(
                dimension_semantics=("parallel", "arbitrary"),
                vmem_limit_bytes=(32 << 20) if resident else None),
        )(*args)

    base = xw_call(mid_dtype, add_bias=False)
    for step in range(n_prop):
        last = step == n_prop - 1
        base = prop_call(base, jnp.float32 if last else mid_dtype, add_bias=last)
    return base[:n, :c_out]


# --------------------------------------------------------------------------- test
def _xavier_uniform(key, shape, dtype=jnp.float32):
    fan_in, fan_out = shape
    bound = (6.0 / (fan_in + fan_out)) ** 0.5
    return jax.random.uniform(key, shape, dtype=dtype, minval=-bound, maxval=bound)


def _make_problem(key, n, c_in, c_out):
    k_feat, k_adj, k_w, k_b = jax.random.split(key, 4)
    features = jax.random.normal(k_feat, (n, c_in), dtype=jnp.float32)
    raw = jax.random.uniform(k_adj, (n, n), dtype=jnp.float32)
    mask = (raw > 0.8).astype(jnp.float32) + jnp.eye(n, dtype=jnp.float32)
    adjacency = mask / jnp.sum(mask, axis=1, keepdims=True)  # row-normalized, dense
    weight = _xavier_uniform(k_w, (c_in, c_out))
    bias = _xavier_uniform(k_b, (1, c_out))
    return adjacency, features, weight, bias


def _reference(adjacency, features, weight, bias, iterations):
    ref = features @ weight
    for _ in range(iterations - 1):
        ref = adjacency @ ref
    return ref + bias


if __name__ == "__main__":
    key = jax.random.PRNGKey(0)
    k1, k2 = jax.random.split(key)

    # 1) Small problem -> fused single-call plan (default "auto" path).
    adj, feat, w, b = _make_problem(k1, 64, 32, 16)
    out = jax.block_until_ready(dense_ngcn_forward(adj, feat, w, b, iterations=3))
    ref = _reference(adj, feat, w, b, 3)
    assert out.shape == (64, 16) and out.dtype == jnp.float32
    assert jnp.allclose(out, ref, atol=5e-2, rtol=5e-2), float(
        jnp.max(jnp.abs(out - ref)))

    # 2) Force the tiled plan with a VMEM-resident base (large-graph path).
    adj2, feat2, w2, b2 = _make_problem(k2, 384, 48, 24)
    ref2 = _reference(adj2, feat2, w2, b2, 4)
    out2 = jax.block_until_ready(
        dense_ngcn_forward(adj2, feat2, w2, b2, iterations=4,
                           mode="tiled", tile=128, resident_base=True))
    assert out2.shape == (384, 24)
    assert jnp.allclose(out2, ref2, atol=5e-2, rtol=5e-2), float(
        jnp.max(jnp.abs(out2 - ref2)))

    # 3) Force the streaming fallback (base re-streamed per K tile; huge-graph path).
    out3 = jax.block_until_ready(
        dense_ngcn_forward(adj2, feat2, w2, b2, iterations=4,
                           mode="tiled", tile=128, resident_base=False))
    assert jnp.allclose(out3, ref2, atol=5e-2, rtol=5e-2), float(
        jnp.max(jnp.abs(out3 - ref2)))

    print("KERNEL_OK")
</pallas_src>

<mosaic_0001>
module attributes {stable_mosaic.version = 11 : i64} {
  func.func @_fused_kernel(%arg0: i32, %arg1: memref<128x128xbf16, #tpu.memory_space<vmem>>, %arg2: memref<128x128xbf16, #tpu.memory_space<vmem>>, %arg3: memref<128x128xbf16, #tpu.memory_space<vmem>>, %arg4: memref<1x128xf32, #tpu.memory_space<vmem>>, %arg5: memref<128x128xf32, #tpu.memory_space<vmem>>, %arg6: memref<128x128xf32, #tpu.memory_space<vmem>>) attributes {dimension_semantics = [#tpu.dimension_semantics<arbitrary>], iteration_bounds = array<i64: 1>, scalar_prefetch = 0 : i64, scratch_operands = 1 : i64, tpu.core_type = #tpu.core_type<tc>, window_params = [{pipeline_mode = #tpu.pipeline_mode<synchronous>, transform_indices = @transform_0, window_bounds = array<i64: 128, 128>}, {pipeline_mode = #tpu.pipeline_mode<synchronous>, transform_indices = @transform_1, window_bounds = array<i64: 128, 128>}, {pipeline_mode = #tpu.pipeline_mode<synchronous>, transform_indices = @transform_2, window_bounds = array<i64: 128, 128>}, {pipeline_mode = #tpu.pipeline_mode<synchronous>, transform_indices = @transform_3, window_bounds = array<i64: 1, 128>}, {pipeline_mode = #tpu.pipeline_mode<synchronous>, transform_indices = @transform_4, window_bounds = array<i64: 128, 128>}]} {
    %c0 = arith.constant 0 : index
    %c0_0 = arith.constant 0 : index
    %0 = vector.load %arg2[%c0, %c0_0] : memref<128x128xbf16, #tpu.memory_space<vmem>>, vector<128x128xbf16>
    %c0_1 = arith.constant 0 : index
    %c0_2 = arith.constant 0 : index
    %1 = vector.load %arg3[%c0_1, %c0_2] : memref<128x128xbf16, #tpu.memory_space<vmem>>, vector<128x128xbf16>
    %cst = arith.constant dense<0.000000e+00> : vector<128x128xf32>
    %2 = tpu.matmul %0, %1, %cst {dimension_numbers = #tpu.dot_dimension_numbers<[1], [0], [0], [1], [0, 0, 1, 1], [], []>} : vector<128x128xbf16>, vector<128x128xbf16>, vector<128x128xf32> -> vector<128x128xf32>
    %c0_3 = arith.constant 0 : index
    %c0_4 = arith.constant 0 : index
    %3 = vector.load %arg6[%c0_3, %c0_4] : memref<128x128xf32, #tpu.memory_space<vmem>>, vector<128x128xf32>
    tpu.vector_store %arg6[%c0_3, %c0_4], %2 {strides = array<i32>} : memref<128x128xf32, #tpu.memory_space<vmem>>, vector<128x128xf32>,
    %c0_5 = arith.constant 0 : index
    %c0_6 = arith.constant 0 : index
    %4 = vector.load %arg1[%c0_5, %c0_6] : memref<128x128xbf16, #tpu.memory_space<vmem>>, vector<128x128xbf16>
    %c0_7 = arith.constant 0 : index
    %c0_8 = arith.constant 0 : index
    %5 = vector.load %arg6[%c0_7, %c0_8] : memref<128x128xf32, #tpu.memory_space<vmem>>, vector<128x128xf32>
    %6 = arith.truncf %5 : vector<128x128xf32> to vector<128x128xbf16>
    %cst_9 = arith.constant dense<0.000000e+00> : vector<128x128xf32>
    %7 = tpu.matmul %4, %6, %cst_9 {dimension_numbers = #tpu.dot_dimension_numbers<[1], [0], [0], [1], [0, 0, 1, 1], [], []>} : vector<128x128xbf16>, vector<128x128xbf16>, vector<128x128xf32> -> vector<128x128xf32>
    %c0_10 = arith.constant 0 : index
    %c0_11 = arith.constant 0 : index
    %8 = vector.load %arg6[%c0_10, %c0_11] : memref<128x128xf32, #tpu.memory_space<vmem>>, vector<128x128xf32>
    tpu.vector_store %arg6[%c0_10, %c0_11], %7 {strides = array<i32>} : memref<128x128xf32, #tpu.memory_space<vmem>>, vector<128x128xf32>,
    %c0_12 = arith.constant 0 : index
    %c0_13 = arith.constant 0 : index
    %9 = vector.load %arg1[%c0_12, %c0_13] : memref<128x128xbf16, #tpu.memory_space<vmem>>, vector<128x128xbf16>
    %c0_14 = arith.constant 0 : index
    %c0_15 = arith.constant 0 : index
    %10 = vector.load %arg6[%c0_14, %c0_15] : memref<128x128xf32, #tpu.memory_space<vmem>>, vector<128x128xf32>
    %11 = arith.truncf %10 : vector<128x128xf32> to vector<128x128xbf16>
    %cst_16 = arith.constant dense<0.000000e+00> : vector<128x128xf32>
    %12 = tpu.matmul %9, %11, %cst_16 {dimension_numbers = #tpu.dot_dimension_numbers<[1], [0], [0], [1], [0, 0, 1, 1], [], []>} : vector<128x128xbf16>, vector<128x128xbf16>, vector<128x128xf32> -> vector<128x128xf32>
    %c0_17 = arith.constant 0 : index
    %c0_18 = arith.constant 0 : index
    %13 = vector.load %arg6[%c0_17, %c0_18] : memref<128x128xf32, #tpu.memory_space<vmem>>, vector<128x128xf32>
    tpu.vector_store %arg6[%c0_17, %c0_18], %12 {strides = array<i32>} : memref<128x128xf32, #tpu.memory_space<vmem>>, vector<128x128xf32>,
    %c0_19 = arith.constant 0 : index
    %c0_20 = arith.constant 0 : index
    %14 = vector.load %arg6[%c0_19, %c0_20] : memref<128x128xf32, #tpu.memory_space<vmem>>, vector<128x128xf32>
    %c0_21 = arith.constant 0 : index
    %c0_22 = arith.constant 0 : index
    %15 = vector.load %arg4[%c0_21, %c0_22] : memref<1x128xf32, #tpu.memory_space<vmem>>, vector<1x128xf32>
    %16 = vector.broadcast %15 : vector<1x128xf32> to vector<128x128xf32>
    %17 = arith.addf %14, %16 : vector<128x128xf32>
    %c0_23 = arith.constant 0 : index
    %c0_24 = arith.constant 0 : index
    %18 = vector.load %arg5[%c0_23, %c0_24] : memref<128x128xf32, #tpu.memory_space<vmem>>, vector<128x128xf32>
    tpu.vector_store %arg5[%c0_23, %c0_24], %17 {strides = array<i32>} : memref<128x128xf32, #tpu.memory_space<vmem>>, vector<128x128xf32>,
    return
  }
  func.func @transform_0(%arg0: i32) -> (i32, i32) {
    %c0_i32 = arith.constant 0 : i32
    %c0_i32_0 = arith.constant 0 : i32
    %c0_i32_1 = arith.constant 0 : i32
    return %c0_i32, %c0_i32_0 : i32, i32
  }
  func.func @transform_1(%arg0: i32) -> (i32, i32) {
    %c0_i32 = arith.constant 0 : i32
    %c0_i32_0 = arith.constant 0 : i32
    %c0_i32_1 = arith.constant 0 : i32
    return %c0_i32, %c0_i32_0 : i32, i32
  }
  func.func @transform_2(%arg0: i32) -> (i32, i32) {
    %c0_i32 = arith.constant 0 : i32
    %c0_i32_0 = arith.constant 0 : i32
    %c0_i32_1 = arith.constant 0 : i32
    return %c0_i32, %c0_i32_0 : i32, i32
  }
  func.func @transform_3(%arg0: i32) -> (i32, i32) {
    %c0_i32 = arith.constant 0 : i32
    %c0_i32_0 = arith.constant 0 : i32
    %c0_i32_1 = arith.constant 0 : i32
    return %c0_i32, %c0_i32_0 : i32, i32
  }
  func.func @transform_4(%arg0: i32) -> (i32, i32) {
    %c0_i32 = arith.constant 0 : i32
    %c0_i32_0 = arith.constant 0 : i32
    %c0_i32_1 = arith.constant 0 : i32
    return %c0_i32, %c0_i32_0 : i32, i32
  }
}

</mosaic_0001>

<bundles_post_ra>
// kernel: tpu_custom_call.1
= control target key start
LH: loop header
LB: loop body
LE: loop exit
PB: predicated region body
PF: predicated region fallthrough
CT: control target
= control target key end

     0   :  { %9 = vsyncpa [#allocation4], 0  ;;  %s979_s0 = inlined_call_operand.hbm [shape: bf16[128,128], index: 0, kind: input, shape index: {}]   ;;  %s980_s1 = inlined_call_operand.hbm [shape: bf16[128,128], index: 1, kind: input, shape index: {}]   ;;  %s981_s2 = inlined_call_operand.hbm [shape: bf16[128,128], index: 2, kind: input, shape index: {}]   ;;  %s982_s3 = inlined_call_operand.vmem [shape: f32[1,128], index: 3, kind: input, shape index: {}]   ;;  %s983_s4 = inlined_call_operand.hbm [shape: f32[128,128], index: 4, kind: output, shape index: {}]  }
   0x1   :  { %10 = vsyncpa [#allocation7], 0 }
   0x2   :  { %11 = vsyncpa [#allocation5], 0  ;;  %s29_s17 = sshll.u32 %s980_s1, 4  ;;  %s931_s18 = smov [#allocation6]   ;;  %s30_s17 = int_to_ptr.hbm [resolvable:$true] %s29_s17 }
   0x3   :  { %s31_s19 = sshll.u32 %s931_s18, 4  ;;  %s16_s22 = sshll.u32 %s979_s0, 4  ;;  %s32_s19 = int_to_ptr.vmem [resolvable:$true] %s31_s19  ;;  %s17_s22 = int_to_ptr.hbm [resolvable:$true] %s16_s22 }
   0x4   :  { %s932_s23 = smov 64   ;;  %s933_s24 = smov 4  }
   0x5   :  { %37 = dma.hbm_to_vmem [thread:$0]  %s30_s17, 1024, %s32_s19, [#allocation7], %s932_s23, %s932_s23, %s933_s24  }
   0x6   :  { %s934_s25 = smov [#allocation3]   ;;  %s42_s29 = sshll.u32 %s981_s2, 4  ;;  %s43_s29 = int_to_ptr.hbm [resolvable:$true] %s42_s29 }
   0x7   :  { %s18_s26 = sshll.u32 %s934_s25, 4  ;;  %s935_s1 = smov [#allocation8]   ;;  %s19_s26 = int_to_ptr.vmem [resolvable:$true] %s18_s26 }
   0x8   :  { %24 = dma.hbm_to_vmem [thread:$0]  %s17_s22, 1024, %s19_s26, [#allocation4], %s932_s23, %s932_s23, %s933_s24  }
   0x9   :  { %s44_s30 = sshll.u32 %s935_s1, 4  ;;  %s45_s30 = int_to_ptr.vmem [resolvable:$true] %s44_s30 }
   0xa   :  { %50 = dma.hbm_to_vmem [thread:$0]  %s43_s29, 1024, %s45_s30, [#allocation7], %s932_s23, %s932_s23, %s933_s24  }
   0xb   :  { %925 = dma.done.wait [#allocation4], 1024  }
   0xc   :  { %926 = vsyncadd [#allocation4], 4294966272 }
   0xd   :  { %927 = dma.done.wait [#allocation7], 2048  }
   0xe   :  { %928 = vsyncadd [#allocation7], 4294965248  ;;  %v779_v0 = vld [vmem:[#allocation8 + $0x38] sm:$0xff]  ;;  %v778_v1 = vld [vmem:[#allocation8 + $0x30] sm:$0xff]  ;;  %s622_s8 = sshll.u32 %s983_s4, 4  ;;  %s937_s9 = smov 128   ;;  %s623_s8 = int_to_ptr.hbm [resolvable:$true] %s622_s8 }
   0xf   :  { %193 = vmatpush.bf16.msra.mxu0 %v779_v0  ;;  %796 = vmatpush.bf16.msra.mxu3 %v779_v0  ;;  %v777_v2 = vld [vmem:[#allocation8 + $0x28] sm:$0xff]  ;;  %v776_v3 = vld [vmem:[#allocation8 + $0x20] sm:$0xff]  ;;  %v775_v4 = vld [vmem:[#allocation8 + $0x18] sm:$0xff]  ;;  %s938_s10 = smov 8  }
  0x10   :  { %v774_v5 = vld [vmem:[#allocation8 + $0x10] sm:$0xff]  ;;  %v773_v6 = vld [vmem:[#allocation8 + $0x8] sm:$0xff]  ;;  %v772_v7 = vld [vmem:[#allocation8] sm:$0xff] }
  0x11   :  { %v764_v8 = vld [vmem:[#allocation6] sm:$0xff]  ;;  %v770_v9 = vld [vmem:[#allocation6 + $0x30] sm:$0xff]  ;;  %v765_v10 = vld [vmem:[#allocation6 + $0x8] sm:$0xff] }
  0x12   :  { %v771_v11 = vld [vmem:[#allocation6 + $0x38] sm:$0xff]  ;;  %v766_v12 = vld [vmem:[#allocation6 + $0x10] sm:$0xff]  ;;  %v768_v14 = vld [vmem:[#allocation6 + $0x20] sm:$0xff] }
  0x13   :  { %194 = vmatpush.bf16.msra.mxu0 %v778_v1  ;;  %797 = vmatpush.bf16.msra.mxu3 %v778_v1  ;;  %v767_v13 = vld [vmem:[#allocation6 + $0x18] sm:$0xff]  ;;  %v769_v15 = vld [vmem:[#allocation6 + $0x28] sm:$0xff]  ;;  %v780_v40 = vld [vmem:[#allocation3] sm:$0xff] }
  0x14   :  { %v786_v41 = vld [vmem:[#allocation3 + $0x30] sm:$0xff]  ;;  %v781_v42 = vld [vmem:[#allocation3 + $0x8] sm:$0xff]  ;;  %v787_v43 = vld [vmem:[#allocation3 + $0x38] sm:$0xff] }
  0x15   :  { %v782_v44 = vld [vmem:[#allocation3 + $0x10] sm:$0xff]  ;;  %v783_v45 = vld [vmem:[#allocation3 + $0x18] sm:$0xff]  ;;  %v784_v46 = vld [vmem:[#allocation3 + $0x20] sm:$0xff] }
  0x16   :  { %v785_v47 = vld [vmem:[#allocation3 + $0x28] sm:$0xff] }
  0x17   :  { %195 = vmatpush.bf16.msra.mxu0 %v777_v2  ;;  %798 = vmatpush.bf16.msra.mxu3 %v777_v2 }
  0x1b   :  { %196 = vmatpush.bf16.msra.mxu0 %v776_v3  ;;  %799 = vmatpush.bf16.msra.mxu3 %v776_v3 }
  0x1f   :  { %197 = vmatpush.bf16.msra.mxu0 %v775_v4  ;;  %800 = vmatpush.bf16.msra.mxu3 %v775_v4 }
  0x23   :  { %198 = vmatpush.bf16.msra.mxu0 %v774_v5  ;;  %801 = vmatpush.bf16.msra.mxu3 %v774_v5 }
  0x27   :  { %199 = vmatpush.bf16.msra.mxu0 %v773_v6  ;;  %802 = vmatpush.bf16.msra.mxu3 %v773_v6 }
  0x2b   :  { %200 = vmatpush.bf16.msra.mxu0 %v772_v7  ;;  %803 = vmatpush.bf16.msra.mxu3 %v772_v7 }
  0x2e   :  { %201 = vmatmul.bf16.vlgmr.msra.gmra.mxu0 %v764_v8  ;;  %231 = vmatmul.bf16.vlgmr.msra.gmra.mxu3 %v770_v9  ;;  %v788_v8 = vld [vmem:[#allocation3] sm:$0xff]  ;;  %v789_v9 = vld [vmem:[#allocation3 + $0x8] sm:$0xff] }
  0x3e   :  { %206 = vmatmul.bf16.gmra.mxu0 %v765_v10  ;;  %236 = vmatmul.bf16.gmra.mxu3 %v771_v11  ;;  %v794_v10 = vld [vmem:[#allocation3 + $0x30] sm:$0xff] }
  0x3f   :  { %v790_v11 = vld [vmem:[#allocation3 + $0x10] sm:$0xff] }
  0x4e   :  { %211 = vmatmul.bf16.gmra.mxu0 %v766_v12  ;;  %v795_v12 = vld [vmem:[#allocation3 + $0x38] sm:$0xff] }
  0x5e   :  { %216 = vmatmul.bf16.gmra.mxu0 %v767_v13  ;;  %v791_v13 = vld [vmem:[#allocation3 + $0x18] sm:$0xff] }
  0x6e   :  { %221 = vmatmul.bf16.gmra.mxu0 %v768_v14  ;;  %v792_v14 = vld [vmem:[#allocation3 + $0x20] sm:$0xff] }
  0x7e   :  { %226 = vmatmul.bf16.gmra.mxu0 %v769_v15  ;;  %v793_v15 = vld [vmem:[#allocation3 + $0x28] sm:$0xff] }
  0xab   :  { %v202_v16 = vpop.f32.mrf.mxu0 }
  0xb1   :  { %v232_v17 = vpop.f32.mrf.mxu3 }
  0xb3   :  { %v204_v18 = vpop.f32.mrf.mxu0 }
  0xb4   :  { %v290_v19 = vpack.c.bf16 %v204_v18, %v202_v16  ;;  %v828_v16 = vld [vmem:[%s982_s3] ss:$0 sm:$0xff]  ;;  %s936_s3 = smov [#allocation9]  }
  0xb5   :  { %s620_s5 = sshll.u32 %s936_s3, 4  ;;  %s621_s5 = int_to_ptr.vmem [resolvable:$true] %s620_s5 }
  0xb9   :  { %v234_v20 = vpop.f32.mrf.mxu3 }
  0xba   :  { %v296_v28 = vpack.c.bf16 %v234_v20, %v232_v17 }
  0xbb   :  { %v207_v21 = vpop.f32.mrf.mxu0 }
  0xc1   :  { %v237_v22 = vpop.f32.mrf.mxu3 }
  0xc3   :  { %v209_v23 = vpop.f32.mrf.mxu0 }
  0xc4   :  { %v291_v24 = vpack.c.bf16 %v209_v23, %v207_v21 }
  0xc9   :  { %v239_v25 = vpop.f32.mrf.mxu3 }
  0xca   :  { %v297_v26 = vpack.c.bf16 %v239_v25, %v237_v22 }
  0xcb   :  { %v212_v27 = vpop.f32.mrf.mxu0 }
  0xcc   :  { %346 = vmatpush.bf16.msra.mxu1 %v297_v26  ;;  %804 = vmatpush.bf16.msrb.mxu3 %v297_v26 }
  0xd0   :  { %347 = vmatpush.bf16.msra.mxu1 %v296_v28  ;;  %805 = vmatpush.bf16.msrb.mxu3 %v296_v28 }
  0xd3   :  { %v214_v29 = vpop.f32.mrf.mxu0 }
  0xd4   :  { %v292_v39 = vpack.c.bf16 %v214_v29, %v212_v27 }
  0xdb   :  { %v217_v30 = vpop.f32.mrf.mxu0 }
  0xe3   :  { %v219_v31 = vpop.f32.mrf.mxu0 }
  0xe4   :  { %v293_v38 = vpack.c.bf16 %v219_v31, %v217_v30 }
  0xeb   :  { %v222_v32 = vpop.f32.mrf.mxu0 }
  0xf3   :  { %v224_v33 = vpop.f32.mrf.mxu0 }
  0xf4   :  { %v294_v37 = vpack.c.bf16 %v224_v33, %v222_v32 }
  0xfb   :  { %v227_v34 = vpop.f32.mrf.mxu0 }
 0x103   :  { %v229_v35 = vpop.f32.mrf.mxu0 }
 0x104   :  { %v295_v36 = vpack.c.bf16 %v229_v35, %v227_v34 }
 0x106   :  { %348 = vmatpush.bf16.msra.mxu1 %v295_v36  ;;  %806 = vmatpush.bf16.msrb.mxu3 %v295_v36 }
 0x10a   :  { %349 = vmatpush.bf16.msra.mxu1 %v294_v37  ;;  %807 = vmatpush.bf16.msrb.mxu3 %v294_v37 }
 0x10e   :  { %350 = vmatpush.bf16.msra.mxu1 %v293_v38  ;;  %808 = vmatpush.bf16.msrb.mxu3 %v293_v38 }
 0x112   :  { %351 = vmatpush.bf16.msra.mxu1 %v292_v39  ;;  %809 = vmatpush.bf16.msrb.mxu3 %v292_v39 }
 0x116   :  { %352 = vmatpush.bf16.msra.mxu1 %v291_v24  ;;  %810 = vmatpush.bf16.msrb.mxu3 %v291_v24 }
 0x11a   :  { %353 = vmatpush.bf16.msra.mxu1 %v290_v19  ;;  %811 = vmatpush.bf16.msrb.mxu3 %v290_v19 }
 0x11d   :  { %354 = vmatmul.bf16.vlgmr.msra.gmra.mxu1 %v780_v40  ;;  %384 = vmatmul.bf16.vlgmr.msrb.gmra.mxu3 %v786_v41 }
 0x12d   :  { %359 = vmatmul.bf16.gmra.mxu1 %v781_v42  ;;  %389 = vmatmul.bf16.gmra.mxu3 %v787_v43 }
 0x13d   :  { %364 = vmatmul.bf16.gmra.mxu1 %v782_v44 }
 0x14d   :  { %369 = vmatmul.bf16.gmra.mxu1 %v783_v45 }
 0x15d   :  { %374 = vmatmul.bf16.gmra.mxu1 %v784_v46 }
 0x16d   :  { %379 = vmatmul.bf16.gmra.mxu1 %v785_v47 }
 0x19a   :  { %v355_v48 = vpop.f32.mrf.mxu1 }
 0x1a0   :  { %v385_v49 = vpop.f32.mrf.mxu3 }
 0x1a2   :  { %v357_v50 = vpop.f32.mrf.mxu1 }
 0x1a3   :  { %v443_v51 = vpack.c.bf16 %v357_v50, %v355_v48 }
 0x1a8   :  { %v387_v52 = vpop.f32.mrf.mxu3 }
 0x1a9   :  { %v449_v60 = vpack.c.bf16 %v387_v52, %v385_v49 }
 0x1aa   :  { %v360_v53 = vpop.f32.mrf.mxu1 }
 0x1b0   :  { %v390_v54 = vpop.f32.mrf.mxu3 }
 0x1b2   :  { %v362_v55 = vpop.f32.mrf.mxu1 }
 0x1b3   :  { %v444_v56 = vpack.c.bf16 %v362_v55, %v360_v53 }
 0x1b8   :  { %v392_v57 = vpop.f32.mrf.mxu3 }
 0x1b9   :  { %v450_v58 = vpack.c.bf16 %v392_v57, %v390_v54 }
 0x1ba   :  { %v365_v59 = vpop.f32.mrf.mxu1 }
 0x1bb   :  { %499 = vmatpush.bf16.msra.mxu2 %v450_v58  ;;  %812 = vmatpush.bf16.msra.mxu3 %v450_v58 }
 0x1bf   :  { %500 = vmatpush.bf16.msra.mxu2 %v449_v60  ;;  %813 = vmatpush.bf16.msra.mxu3 %v449_v60 }
 0x1c2   :  { %v367_v61 = vpop.f32.mrf.mxu1 }
 0x1c3   :  { %v445_v7 = vpack.c.bf16 %v367_v61, %v365_v59 }
 0x1ca   :  { %v370_v62 = vpop.f32.mrf.mxu1 }
 0x1d2   :  { %v372_v63 = vpop.f32.mrf.mxu1 }
 0x1d3   :  { %v446_v6 = vpack.c.bf16 %v372_v63, %v370_v62 }
 0x1da   :  { %v375_v0 = vpop.f32.mrf.mxu1 }
 0x1e2   :  { %v377_v1 = vpop.f32.mrf.mxu1 }
 0x1e3   :  { %v447_v5 = vpack.c.bf16 %v377_v1, %v375_v0 }
 0x1ea   :  { %v380_v2 = vpop.f32.mrf.mxu1 }
 0x1f2   :  { %v382_v3 = vpop.f32.mrf.mxu1 }
 0x1f3   :  { %v448_v4 = vpack.c.bf16 %v382_v3, %v380_v2 }
 0x1f5   :  { %501 = vmatpush.bf16.msra.mxu2 %v448_v4  ;;  %814 = vmatpush.bf16.msra.mxu3 %v448_v4 }
 0x1f9   :  { %502 = vmatpush.bf16.msra.mxu2 %v447_v5  ;;  %815 = vmatpush.bf16.msra.mxu3 %v447_v5 }
 0x1fd   :  { %503 = vmatpush.bf16.msra.mxu2 %v446_v6  ;;  %816 = vmatpush.bf16.msra.mxu3 %v446_v6 }
 0x201   :  { %504 = vmatpush.bf16.msra.mxu2 %v445_v7  ;;  %817 = vmatpush.bf16.msra.mxu3 %v445_v7 }
 0x205   :  { %505 = vmatpush.bf16.msra.mxu2 %v444_v56  ;;  %818 = vmatpush.bf16.msra.mxu3 %v444_v56 }
 0x209   :  { %506 = vmatpush.bf16.msra.mxu2 %v443_v51  ;;  %819 = vmatpush.bf16.msra.mxu3 %v443_v51 }
 0x20c   :  { %507 = vmatmul.bf16.vlgmr.msra.gmra.mxu2 %v788_v8  ;;  %537 = vmatmul.bf16.vlgmr.msra.gmra.mxu3 %v794_v10 }
 0x21c   :  { %512 = vmatmul.bf16.gmra.mxu2 %v789_v9  ;;  %542 = vmatmul.bf16.gmra.mxu3 %v795_v12 }
 0x22c   :  { %517 = vmatmul.bf16.gmra.mxu2 %v790_v11 }
 0x23c   :  { %522 = vmatmul.bf16.gmra.mxu2 %v791_v13 }
 0x24c   :  { %527 = vmatmul.bf16.gmra.mxu2 %v792_v14 }
 0x25c   :  { %532 = vmatmul.bf16.gmra.mxu2 %v793_v15 }
 0x28f   :  { %v508_v17 = vpop.f32.mrf.mxu2  ;;  %v538_v24 = vpop.f32.mrf.mxu3 }
 0x290   :  { %v584_v18 = vadd.f32 %v828_v16, %v508_v17  ;;  %v596_v26 = vadd.f32 %v828_v16, %v538_v24 }
 0x292   :  { %600 = vst [vmem:[#allocation9] sm:$0xff] %v584_v18 }
 0x293   :  { %612 = vst [vmem:[#allocation9 + $0x60] sm:$0xff] %v596_v26 }
 0x297   :  { %v510_v19 = vpop.f32.mrf.mxu2  ;;  %v540_v28 = vpop.f32.mrf.mxu3 }
 0x298   :  { %v585_v20 = vadd.f32 %v828_v16, %v510_v19  ;;  %v597_v30 = vadd.f32 %v828_v16, %v540_v28 }
 0x29a   :  { %601 = vst [vmem:[#allocation9 + $0x8] sm:$0xff] %v585_v20 }
 0x29b   :  { %613 = vst [vmem:[#allocation9 + $0x68] sm:$0xff] %v597_v30 }
 0x29f   :  { %v513_v21 = vpop.f32.mrf.mxu2  ;;  %v543_v32 = vpop.f32.mrf.mxu3 }
 0x2a0   :  { %v586_v22 = vadd.f32 %v828_v16, %v513_v21  ;;  %v598_v34 = vadd.f32 %v828_v16, %v543_v32 }
 0x2a2   :  { %602 = vst [vmem:[#allocation9 + $0x10] sm:$0xff] %v586_v22 }
 0x2a3   :  { %614 = vst [vmem:[#allocation9 + $0x70] sm:$0xff] %v598_v34 }
 0x2a7   :  { %v515_v23 = vpop.f32.mrf.mxu2  ;;  %v545_v36 = vpop.f32.mrf.mxu3 }
 0x2a8   :  { %v587_v25 = vadd.f32 %v828_v16, %v515_v23  ;;  %v599_v38 = vadd.f32 %v828_v16, %v545_v36 }
 0x2aa   :  { %603 = vst [vmem:[#allocation9 + $0x18] sm:$0xff] %v587_v25 }
 0x2ab   :  { %615 = vst [vmem:[#allocation9 + $0x78] sm:$0xff] %v599_v38 }
 0x2af   :  { %v518_v27 = vpop.f32.mrf.mxu2 }
 0x2b0   :  { %v588_v29 = vadd.f32 %v828_v16, %v518_v27 }
 0x2b2   :  { %604 = vst [vmem:[#allocation9 + $0x20] sm:$0xff] %v588_v29 }
 0x2b7   :  { %v520_v31 = vpop.f32.mrf.mxu2 }
 0x2b8   :  { %v589_v33 = vadd.f32 %v828_v16, %v520_v31 }
 0x2ba   :  { %605 = vst [vmem:[#allocation9 + $0x28] sm:$0xff] %v589_v33 }
 0x2bf   :  { %v523_v35 = vpop.f32.mrf.mxu2 }
 0x2c0   :  { %v590_v37 = vadd.f32 %v828_v16, %v523_v35 }
 0x2c2   :  { %606 = vst [vmem:[#allocation9 + $0x30] sm:$0xff] %v590_v37 }
 0x2c7   :  { %v525_v39 = vpop.f32.mrf.mxu2 }
 0x2c8   :  { %v591_v40 = vadd.f32 %v828_v16, %v525_v39 }
 0x2ca   :  { %607 = vst [vmem:[#allocation9 + $0x38] sm:$0xff] %v591_v40 }
 0x2cf   :  { %v528_v41 = vpop.f32.mrf.mxu2 }
 0x2d0   :  { %v592_v42 = vadd.f32 %v828_v16, %v528_v41 }
 0x2d2   :  { %608 = vst [vmem:[#allocation9 + $0x40] sm:$0xff] %v592_v42 }
 0x2d7   :  { %v530_v43 = vpop.f32.mrf.mxu2 }
 0x2d8   :  { %v593_v44 = vadd.f32 %v828_v16, %v530_v43 }
 0x2da   :  { %609 = vst [vmem:[#allocation9 + $0x48] sm:$0xff] %v593_v44 }
 0x2df   :  { %v533_v45 = vpop.f32.mrf.mxu2 }
 0x2e0   :  { %v594_v46 = vadd.f32 %v828_v16, %v533_v45 }
 0x2e2   :  { %610 = vst [vmem:[#allocation9 + $0x50] sm:$0xff] %v594_v46 }
 0x2e7   :  { %v535_v47 = vpop.f32.mrf.mxu2 }
 0x2e8   :  { %v595_v48 = vadd.f32 %v828_v16, %v535_v47 }
 0x2ea   :  { %611 = vst [vmem:[#allocation9 + $0x58] sm:$0xff] %v595_v48 }
 0x2eb   :  { %628 = dma.vmem_to_hbm [thread:$0]  %s621_s5, 2048, %s623_s8, [#allocation5], %s937_s9, %s937_s9, %s938_s10  }
 0x2ec   :  { %929 = dma.done.wait [#allocation5], 2048  }
 0x2ed   :  { %930 = vsyncadd [#allocation5], 4294965248 }
 0x2ee   :  { %633 = vsyncpa [#allocation4], 1 }
 0x2ef   :  { %634 = vsyncpa [#allocation7], 1 }
 0x2f0   :  { %635 = vsyncpa [#allocation5], 1 }

</bundles_post_ra>
